<compile_context>
chip_gen: v5e
topology: v5e:2x2
jax: 0.10.0
libtpu: 0.0.40
codegen_flags: <defaults>
</compile_context>

<pallas_src>
import functools

import jax
import jax.numpy as jnp
from jax import lax
from jax.experimental import pallas as pl
from jax.experimental.pallas import tpu as pltpu


# ----------------------------------------------------------------------------
# Kernel 1: MoCo projection heads + L2 normalize + positive logit.
# All operands are (N, C)-sized or smaller -> single un-gridded call, fully
# VMEM-resident.  1/T is folded into q once, so the large l_neg tiles produced
# by kernel 2 never need an extra (N, K)-sized VPU rescale.
# ----------------------------------------------------------------------------
def moco_head_kernel(rq_ref, rk_ref,
                     wq1_ref, bq1_ref, wq2_ref, bq2_ref,
                     wk1_ref, bk1_ref, wk2_ref, bk2_ref,
                     q_ref, k_ref, lpos_ref, *, inv_t):
    rq = rq_ref[...]                                   # (N, C) bf16
    rk = rk_ref[...]                                   # (N, C) bf16

    # query MLP head: Linear -> ReLU -> Linear (bf16 MXU, f32 accumulate)
    hq = jnp.maximum(
        jnp.dot(rq, wq1_ref[...], preferred_element_type=jnp.float32)
        + bq1_ref[...], 0.0)
    q = (jnp.dot(hq.astype(jnp.bfloat16), wq2_ref[...],
                 preferred_element_type=jnp.float32) + bq2_ref[...])

    # key MLP head (momentum / frozen encoder): Linear -> ReLU -> Linear
    hk = jnp.maximum(
        jnp.dot(rk, wk1_ref[...], preferred_element_type=jnp.float32)
        + bk1_ref[...], 0.0)
    k = (jnp.dot(hk.astype(jnp.bfloat16), wk2_ref[...],
                 preferred_element_type=jnp.float32) + bk2_ref[...])

    # L2 normalize along the feature dim (matches F.normalize eps=1e-12)
    q = q * lax.rsqrt(jnp.maximum(jnp.sum(q * q, axis=1, keepdims=True), 1e-24))
    k = k * lax.rsqrt(jnp.maximum(jnp.sum(k * k, axis=1, keepdims=True), 1e-24))

    # positive logit, computed in f32 BEFORE the bf16 cast; scaled by 1/T
    lp = jnp.sum(q * k, axis=1, keepdims=True) * inv_t        # (N, 1)
    lpos_ref[...] = jnp.broadcast_to(lp, lpos_ref.shape)      # lane-padded store

    q = q * inv_t                                      # fold 1/T into q once
    q_ref[...] = q.astype(q_ref.dtype)                 # (N, C) bf16 -> feeds l_neg
    k_ref[...] = k.astype(k_ref.dtype)                 # (N, C) bf16 keys (enqueue)


# ----------------------------------------------------------------------------
# Kernel 2: negative logits — q @ queue, gridded/tiled over K.
# Queue tiles are streamed (double-buffered by the Pallas pipeline) in bf16;
# q's block index is grid-invariant so it is DMA'd once and stays resident.
# ----------------------------------------------------------------------------
def moco_lneg_kernel(q_ref, queue_ref, lneg_ref):
    # (N, C) bf16 @ (C, TK) bf16 -> (N, TK) f32 ; 1/T already folded into q.
    lneg_ref[...] = jnp.dot(q_ref[...], queue_ref[...],
                            preferred_element_type=jnp.float32)


def _pick_queue_tile(k_sz, tk_request):
    """Largest 128-aligned tile <= tk_request that divides K."""
    assert k_sz % 128 == 0, "queue size K must be a multiple of 128"
    tk = max(128, min(tk_request, k_sz) // 128 * 128)
    while k_sz % tk != 0:
        tk -= 128
    return tk


def moco_head(rep_q, rep_k, mlp_q, mlp_k, queue, temperature, *, tk=4096):
    """Fused MoCo head. Returns (l_pos (N,1), l_neg (N,K), k_keys (N,C) bf16)."""
    n, c = rep_q.shape
    k_sz = queue.shape[1]
    # TK<=4096 keeps double-buffered bf16 queue tiles + f32 output tiles well
    # within every generation's scoped VMEM (incl. v7x 64 MiB physical).
    tk = _pick_queue_tile(k_sz, tk)

    bf16 = jnp.bfloat16
    head_args = (rep_q.astype(bf16), rep_k.astype(bf16),
                 mlp_q["w1"].astype(bf16), mlp_q["b1"],
                 mlp_q["w2"].astype(bf16), mlp_q["b2"],
                 mlp_k["w1"].astype(bf16), mlp_k["b1"],
                 mlp_k["w2"].astype(bf16), mlp_k["b2"])
    vmem = lambda: pl.BlockSpec(memory_space=pltpu.MemorySpace.VMEM)

    q_scaled, k_keys, lpos_pad = pl.pallas_call(
        functools.partial(moco_head_kernel, inv_t=1.0 / temperature),
        out_shape=(
            jax.ShapeDtypeStruct((n, c), bf16),            # q / T
            jax.ShapeDtypeStruct((n, c), bf16),            # k keys for enqueue
            jax.ShapeDtypeStruct((n, 128), jnp.float32),   # l_pos (lane-padded)
        ),
        in_specs=[vmem() for _ in head_args],
        out_specs=(vmem(), vmem(), vmem()),
    )(*head_args)

    l_neg = pl.pallas_call(
        moco_lneg_kernel,
        grid=(k_sz // tk,),
        out_shape=jax.ShapeDtypeStruct((n, k_sz), jnp.float32),
        in_specs=[
            pl.BlockSpec((n, c), lambda j: (0, 0)),    # q: grid-invariant block
            pl.BlockSpec((c, tk), lambda j: (0, j)),   # queue: streamed K tiles
        ],
        out_specs=pl.BlockSpec((n, tk), lambda j: (0, j)),
        compiler_params=pltpu.CompilerParams(
            dimension_semantics=("parallel",),         # v7x: split tiles on 2 TCs
            vmem_limit_bytes=32 * 1024 * 1024),
        cost_estimate=pl.CostEstimate(
            flops=2 * n * c * k_sz,
            transcendentals=0,
            bytes_accessed=n * c * 2 + c * k_sz * 2 + n * k_sz * 4),
    )(q_scaled, queue)

    return lpos_pad[:, :1], l_neg, k_keys


# ----------------------------------------------------------------------------
# Stand-in base_encoder: single-layer bidirectional GRU (plain JAX glue)
# ----------------------------------------------------------------------------
def _gru_direction(x, params, reverse=False):
    # x: (N, T, I) -> (h_last (N, H), hs (N, T, H))
    wi, wh, bi, bh = params["wi"], params["wh"], params["bi"], params["bh"]
    n, _, _ = x.shape
    h0 = jnp.zeros((n, wh.shape[0]), jnp.float32)
    xs = jnp.swapaxes(x, 0, 1)                      # (T, N, I)
    if reverse:
        xs = xs[::-1]

    def step(h, x_t):
        gi = x_t @ wi + bi
        gh = h @ wh + bh
        i_r, i_z, i_n = jnp.split(gi, 3, axis=-1)
        h_r, h_z, h_n = jnp.split(gh, 3, axis=-1)
        r = jax.nn.sigmoid(i_r + h_r)
        z = jax.nn.sigmoid(i_z + h_z)
        nn_ = jnp.tanh(i_n + r * h_n)
        h_new = (1.0 - z) * nn_ + z * h
        return h_new, h_new

    h_last, hs = lax.scan(step, h0, xs)
    if reverse:
        hs = hs[::-1]
    return h_last, jnp.swapaxes(hs, 0, 1)           # (N,H), (N,T,H)


def encode(gru_params, x):
    # TODO(synk): `num_frame` (variable-length masking) of the external
    # base_encoder is not modelled; the full sequence is used.
    hf, feats_f = _gru_direction(x, gru_params["fwd"], reverse=False)
    hb, feats_b = _gru_direction(x, gru_params["bwd"], reverse=True)
    features = jnp.concatenate([feats_f, feats_b], axis=-1)   # (N, T, 2H)
    rep = jnp.concatenate([hf, hb], axis=-1)                  # (N, 2H)
    return features, rep


# ----------------------------------------------------------------------------
# Parameter / buffer init (deterministic, synthetic)
# ----------------------------------------------------------------------------
def init_params(key, input_size, hidden_units, queue_k):
    c = hidden_units * 2
    keys = jax.random.split(key, 16)

    def gru_dir(k0, k1, k2, k3):
        s = 0.1
        return dict(
            wi=s * jax.random.normal(k0, (input_size, 3 * hidden_units), jnp.float32),
            wh=s * jax.random.normal(k1, (hidden_units, 3 * hidden_units), jnp.float32),
            bi=s * jax.random.normal(k2, (3 * hidden_units,), jnp.float32),
            bh=s * jax.random.normal(k3, (3 * hidden_units,), jnp.float32),
        )

    gru_q = dict(fwd=gru_dir(*keys[0:4]), bwd=gru_dir(*keys[4:8]))
    # update_key_encoder=True => key GRU params copied from query GRU at init
    gru_k = jax.tree_util.tree_map(lambda p: p, gru_q)

    def mlp(k0, k1):
        s = 0.1
        return dict(
            w1=s * jax.random.normal(k0, (c, c), jnp.float32),          # x @ W
            b1=jnp.zeros((1, c), jnp.float32),
            w2=s * jax.random.normal(k1, (c, c), jnp.float32),
            b2=jnp.zeros((1, c), jnp.float32),
        )

    mlp_q = mlp(keys[8], keys[9])
    mlp_k = mlp(keys[10], keys[11])   # update_key_mlp=False => independent init

    queue = jax.random.normal(keys[12], (c, queue_k), jnp.float32)
    queue = queue / jnp.maximum(
        jnp.sqrt(jnp.sum(queue * queue, axis=0, keepdims=True)), 1e-12)
    # persistent bf16 queue: halves HBM traffic of the dominant l_neg read
    queue = queue.astype(jnp.bfloat16)
    queue_ptr = jnp.zeros((1,), jnp.int32)
    return dict(gru_q=gru_q, gru_k=gru_k, mlp_q=mlp_q, mlp_k=mlp_k), queue, queue_ptr


# ----------------------------------------------------------------------------
# MoCo forward (functional: returns new key-encoder params / queue / ptr)
# ----------------------------------------------------------------------------
def moco_forward(params, queue, queue_ptr, im_q, im_k, num_frame,
                 *, m=0.999, temperature=0.07, tk=4096):
    del num_frame  # see TODO in encode()
    queue_k = queue.shape[1]
    n = im_q.shape[0]

    # ---- query encoder ----
    features, rep_q = encode(params["gru_q"], im_q)

    # ---- momentum update of key encoder (update_key_encoder=True) ----
    gru_k_new = jax.tree_util.tree_map(
        lambda pk, pq: pk * m + pq * (1.0 - m), params["gru_k"], params["gru_q"])
    # update_key_mlp=False -> key MLP is left untouched.

    # ---- key encoder (no grad in torch; pure fn here) ----
    _, rep_k = encode(gru_k_new, im_k)

    # ---- Pallas MoCo head: MLP heads + normalize + contrastive logits ----
    l_pos, l_neg, k_keys = moco_head(
        rep_q, rep_k, params["mlp_q"], params["mlp_k"], queue, temperature, tk=tk)
    # scaling by 1/T already applied inside the kernels (folded into q)
    logits = jnp.concatenate([l_pos, l_neg], axis=1)            # (N, 1+K)

    # torch.long labels -> int32 (JAX default 32-bit)
    labels = jnp.zeros((logits.shape[0],), jnp.int32)

    # ---- dequeue & enqueue (functional buffer update) ----
    # The queue is donated at the jit boundary so XLA updates the N columns in
    # place rather than copying the full (C, K) buffer.
    # TODO(synk): could be moved fully in-kernel via input_output_aliases +
    # scalar-prefetched queue_ptr; left in the wrapper for robustness.
    queue_new = lax.dynamic_update_slice(
        queue, k_keys.astype(queue.dtype).T, (0, queue_ptr[0]))
    ptr_new = jnp.array([(queue_ptr[0] + n) % queue_k], jnp.int32)

    new_params = dict(params, gru_k=gru_k_new)
    return (features, logits, labels), (new_params, queue_new, ptr_new)


# ----------------------------------------------------------------------------
if __name__ == "__main__":
    # small shapes: batch=4, seq=8, input_size=16, hidden_units=64 (C=128 for a
    # full 128-lane MXU contraction), K=512 with TK=256 -> 2-step pipelined grid
    N, T_SEQ, INPUT_SIZE, HIDDEN = 4, 8, 16, 64
    QUEUE_K, TK = 512, 256
    assert QUEUE_K % N == 0   # mirrors the assert in _dequeue_and_enqueue

    root = jax.random.PRNGKey(0)
    kp, kq, kk = jax.random.split(root, 3)
    params, queue, queue_ptr = init_params(kp, INPUT_SIZE, HIDDEN, QUEUE_K)

    im_q = jax.random.normal(kq, (N, T_SEQ, INPUT_SIZE), jnp.float32)
    im_k = jax.random.normal(kk, (N, T_SEQ, INPUT_SIZE), jnp.float32)
    num_frame = jnp.full((N,), T_SEQ, jnp.int32)

    fwd = jax.jit(
        functools.partial(moco_forward, m=0.999, temperature=0.07, tk=TK),
        donate_argnums=(1,))   # donate the queue buffer -> in-place enqueue
    (features, logits, labels), (new_params, new_queue, new_ptr) = fwd(
        params, queue, queue_ptr, im_q, im_k, num_frame)

    jax.block_until_ready((features, logits, labels, new_queue, new_ptr))
    assert features.shape == (N, T_SEQ, 2 * HIDDEN)
    assert logits.shape == (N, 1 + QUEUE_K)
    assert labels.shape == (N,)
    assert new_queue.shape == (2 * HIDDEN, QUEUE_K)
    print("KERNEL_OK")
</pallas_src>

<mosaic_0001>
module attributes {stable_mosaic.version = 11 : i64} {
  func.func @moco_head_kernel(%arg0: memref<4x128xbf16, #tpu.memory_space<vmem>>, %arg1: memref<4x128xbf16, #tpu.memory_space<vmem>>, %arg2: memref<128x128xbf16, #tpu.memory_space<vmem>>, %arg3: memref<1x128xf32, #tpu.memory_space<vmem>>, %arg4: memref<128x128xbf16, #tpu.memory_space<vmem>>, %arg5: memref<1x128xf32, #tpu.memory_space<vmem>>, %arg6: memref<128x128xbf16, #tpu.memory_space<vmem>>, %arg7: memref<1x128xf32, #tpu.memory_space<vmem>>, %arg8: memref<128x128xbf16, #tpu.memory_space<vmem>>, %arg9: memref<1x128xf32, #tpu.memory_space<vmem>>, %arg10: memref<4x128xbf16, #tpu.memory_space<vmem>>, %arg11: memref<4x128xbf16, #tpu.memory_space<vmem>>, %arg12: memref<4x128xf32, #tpu.memory_space<vmem>>) attributes {dimension_semantics = [], scalar_prefetch = 0 : i64, scratch_operands = 0 : i64, tpu.core_type = #tpu.core_type<tc>} {
    %c0 = arith.constant 0 : index
    %c0_0 = arith.constant 0 : index
    %0 = vector.load %arg0[%c0, %c0_0] : memref<4x128xbf16, #tpu.memory_space<vmem>>, vector<4x128xbf16>
    %c0_1 = arith.constant 0 : index
    %c0_2 = arith.constant 0 : index
    %1 = vector.load %arg1[%c0_1, %c0_2] : memref<4x128xbf16, #tpu.memory_space<vmem>>, vector<4x128xbf16>
    %c0_3 = arith.constant 0 : index
    %c0_4 = arith.constant 0 : index
    %2 = vector.load %arg2[%c0_3, %c0_4] : memref<128x128xbf16, #tpu.memory_space<vmem>>, vector<128x128xbf16>
    %cst = arith.constant dense<0.000000e+00> : vector<4x128xf32>
    %3 = tpu.matmul %0, %2, %cst {dimension_numbers = #tpu.dot_dimension_numbers<[1], [0], [0], [1], [0, 0, 1, 1], [], []>} : vector<4x128xbf16>, vector<128x128xbf16>, vector<4x128xf32> -> vector<4x128xf32>
    %c0_5 = arith.constant 0 : index
    %c0_6 = arith.constant 0 : index
    %4 = vector.load %arg3[%c0_5, %c0_6] : memref<1x128xf32, #tpu.memory_space<vmem>>, vector<1x128xf32>
    %5 = vector.broadcast %4 : vector<1x128xf32> to vector<4x128xf32>
    %6 = arith.addf %3, %5 : vector<4x128xf32>
    %cst_7 = arith.constant 0.000000e+00 : f32
    %7 = vector.broadcast %cst_7 : f32 to vector<4x128xf32>
    %8 = arith.maximumf %6, %7 : vector<4x128xf32>
    %9 = arith.truncf %8 : vector<4x128xf32> to vector<4x128xbf16>
    %c0_8 = arith.constant 0 : index
    %c0_9 = arith.constant 0 : index
    %10 = vector.load %arg4[%c0_8, %c0_9] : memref<128x128xbf16, #tpu.memory_space<vmem>>, vector<128x128xbf16>
    %cst_10 = arith.constant dense<0.000000e+00> : vector<4x128xf32>
    %11 = tpu.matmul %9, %10, %cst_10 {dimension_numbers = #tpu.dot_dimension_numbers<[1], [0], [0], [1], [0, 0, 1, 1], [], []>} : vector<4x128xbf16>, vector<128x128xbf16>, vector<4x128xf32> -> vector<4x128xf32>
    %c0_11 = arith.constant 0 : index
    %c0_12 = arith.constant 0 : index
    %12 = vector.load %arg5[%c0_11, %c0_12] : memref<1x128xf32, #tpu.memory_space<vmem>>, vector<1x128xf32>
    %13 = vector.broadcast %12 : vector<1x128xf32> to vector<4x128xf32>
    %14 = arith.addf %11, %13 : vector<4x128xf32>
    %c0_13 = arith.constant 0 : index
    %c0_14 = arith.constant 0 : index
    %15 = vector.load %arg6[%c0_13, %c0_14] : memref<128x128xbf16, #tpu.memory_space<vmem>>, vector<128x128xbf16>
    %cst_15 = arith.constant dense<0.000000e+00> : vector<4x128xf32>
    %16 = tpu.matmul %1, %15, %cst_15 {dimension_numbers = #tpu.dot_dimension_numbers<[1], [0], [0], [1], [0, 0, 1, 1], [], []>} : vector<4x128xbf16>, vector<128x128xbf16>, vector<4x128xf32> -> vector<4x128xf32>
    %c0_16 = arith.constant 0 : index
    %c0_17 = arith.constant 0 : index
    %17 = vector.load %arg7[%c0_16, %c0_17] : memref<1x128xf32, #tpu.memory_space<vmem>>, vector<1x128xf32>
    %18 = vector.broadcast %17 : vector<1x128xf32> to vector<4x128xf32>
    %19 = arith.addf %16, %18 : vector<4x128xf32>
    %cst_18 = arith.constant 0.000000e+00 : f32
    %20 = vector.broadcast %cst_18 : f32 to vector<4x128xf32>
    %21 = arith.maximumf %19, %20 : vector<4x128xf32>
    %22 = arith.truncf %21 : vector<4x128xf32> to vector<4x128xbf16>
    %c0_19 = arith.constant 0 : index
    %c0_20 = arith.constant 0 : index
    %23 = vector.load %arg8[%c0_19, %c0_20] : memref<128x128xbf16, #tpu.memory_space<vmem>>, vector<128x128xbf16>
    %cst_21 = arith.constant dense<0.000000e+00> : vector<4x128xf32>
    %24 = tpu.matmul %22, %23, %cst_21 {dimension_numbers = #tpu.dot_dimension_numbers<[1], [0], [0], [1], [0, 0, 1, 1], [], []>} : vector<4x128xbf16>, vector<128x128xbf16>, vector<4x128xf32> -> vector<4x128xf32>
    %c0_22 = arith.constant 0 : index
    %c0_23 = arith.constant 0 : index
    %25 = vector.load %arg9[%c0_22, %c0_23] : memref<1x128xf32, #tpu.memory_space<vmem>>, vector<1x128xf32>
    %26 = vector.broadcast %25 : vector<1x128xf32> to vector<4x128xf32>
    %27 = arith.addf %24, %26 : vector<4x128xf32>
    %28 = arith.mulf %14, %14 : vector<4x128xf32>
    %cst_24 = arith.constant dense<0.000000e+00> : vector<4xf32>
    %29 = vector.multi_reduction <add>, %28, %cst_24 [1] : vector<4x128xf32> to vector<4xf32>
    %30 = vector.shape_cast %29 : vector<4xf32> to vector<4x1xf32>
    %cst_25 = arith.constant 1.000000e-24 : f32
    %31 = vector.broadcast %cst_25 : f32 to vector<4x1xf32>
    %32 = arith.maximumf %30, %31 : vector<4x1xf32>
    %33 = math.rsqrt %32 : vector<4x1xf32>
    %34 = vector.broadcast %33 : vector<4x1xf32> to vector<4x128xf32>
    %35 = arith.mulf %14, %34 : vector<4x128xf32>
    %36 = arith.mulf %27, %27 : vector<4x128xf32>
    %cst_26 = arith.constant dense<0.000000e+00> : vector<4xf32>
    %37 = vector.multi_reduction <add>, %36, %cst_26 [1] : vector<4x128xf32> to vector<4xf32>
    %38 = vector.shape_cast %37 : vector<4xf32> to vector<4x1xf32>
    %cst_27 = arith.constant 1.000000e-24 : f32
    %39 = vector.broadcast %cst_27 : f32 to vector<4x1xf32>
    %40 = arith.maximumf %38, %39 : vector<4x1xf32>
    %41 = math.rsqrt %40 : vector<4x1xf32>
    %42 = vector.broadcast %41 : vector<4x1xf32> to vector<4x128xf32>
    %43 = arith.mulf %27, %42 : vector<4x128xf32>
    %44 = arith.mulf %35, %43 : vector<4x128xf32>
    %cst_28 = arith.constant dense<0.000000e+00> : vector<4xf32>
    %45 = vector.multi_reduction <add>, %44, %cst_28 [1] : vector<4x128xf32> to vector<4xf32>
    %46 = vector.shape_cast %45 : vector<4xf32> to vector<4x1xf32>
    %cst_29 = arith.constant 14.2857141 : f32
    %47 = vector.broadcast %cst_29 : f32 to vector<4x1xf32>
    %48 = arith.mulf %46, %47 : vector<4x1xf32>
    %49 = vector.shape_cast %48 : vector<4x1xf32> to vector<4x1xf32>
    %50 = vector.broadcast %49 : vector<4x1xf32> to vector<4x128xf32>
    %c0_30 = arith.constant 0 : index
    %c0_31 = arith.constant 0 : index
    %51 = vector.load %arg12[%c0_30, %c0_31] : memref<4x128xf32, #tpu.memory_space<vmem>>, vector<4x128xf32>
    tpu.vector_store %arg12[%c0_30, %c0_31], %50 {strides = array<i32>} : memref<4x128xf32, #tpu.memory_space<vmem>>, vector<4x128xf32>,
    %cst_32 = arith.constant 14.2857141 : f32
    %52 = vector.broadcast %cst_32 : f32 to vector<4x128xf32>
    %53 = arith.mulf %35, %52 : vector<4x128xf32>
    %54 = arith.truncf %53 : vector<4x128xf32> to vector<4x128xbf16>
    %c0_33 = arith.constant 0 : index
    %c0_34 = arith.constant 0 : index
    %55 = vector.load %arg10[%c0_33, %c0_34] : memref<4x128xbf16, #tpu.memory_space<vmem>>, vector<4x128xbf16>
    tpu.vector_store %arg10[%c0_33, %c0_34], %54 {strides = array<i32>} : memref<4x128xbf16, #tpu.memory_space<vmem>>, vector<4x128xbf16>,
    %56 = arith.truncf %43 : vector<4x128xf32> to vector<4x128xbf16>
    %c0_35 = arith.constant 0 : index
    %c0_36 = arith.constant 0 : index
    %57 = vector.load %arg11[%c0_35, %c0_36] : memref<4x128xbf16, #tpu.memory_space<vmem>>, vector<4x128xbf16>
    tpu.vector_store %arg11[%c0_35, %c0_36], %56 {strides = array<i32>} : memref<4x128xbf16, #tpu.memory_space<vmem>>, vector<4x128xbf16>,
    return
  }
}

module attributes {stable_mosaic.version = 11 : i64} {
  func.func @moco_lneg_kernel(%arg0: i32, %arg1: memref<4x128xbf16, #tpu.memory_space<vmem>>, %arg2: memref<128x256xbf16, #tpu.memory_space<vmem>>, %arg3: memref<4x256xf32, #tpu.memory_space<vmem>>) attributes {dimension_semantics = [#tpu.dimension_semantics<parallel>], iteration_bounds = array<i64: 2>, scalar_prefetch = 0 : i64, scratch_operands = 0 : i64, tpu.core_type = #tpu.core_type<tc>, window_params = [{pipeline_mode = #tpu.pipeline_mode<synchronous>, transform_indices = @transform_0, window_bounds = array<i64: 4, 128>}, {transform_indices = @transform_1, window_bounds = array<i64: 128, 256>}, {transform_indices = @transform_2, window_bounds = array<i64: 4, 256>}]} {
    %c0 = arith.constant 0 : index
    %c0_0 = arith.constant 0 : index
    %0 = vector.load %arg1[%c0, %c0_0] : memref<4x128xbf16, #tpu.memory_space<vmem>>, vector<4x128xbf16>
    %c0_1 = arith.constant 0 : index
    %c0_2 = arith.constant 0 : index
    %1 = vector.load %arg2[%c0_1, %c0_2] : memref<128x256xbf16, #tpu.memory_space<vmem>>, vector<128x256xbf16>
    %cst = arith.constant dense<0.000000e+00> : vector<4x256xf32>
    %2 = tpu.matmul %0, %1, %cst {dimension_numbers = #tpu.dot_dimension_numbers<[1], [0], [0], [1], [0, 0, 1, 1], [], []>} : vector<4x128xbf16>, vector<128x256xbf16>, vector<4x256xf32> -> vector<4x256xf32>
    %c0_3 = arith.constant 0 : index
    %c0_4 = arith.constant 0 : index
    %3 = vector.load %arg3[%c0_3, %c0_4] : memref<4x256xf32, #tpu.memory_space<vmem>>, vector<4x256xf32>
    tpu.vector_store %arg3[%c0_3, %c0_4], %2 {strides = array<i32>} : memref<4x256xf32, #tpu.memory_space<vmem>>, vector<4x256xf32>,
    return
  }
  func.func @transform_0(%arg0: i32) -> (i32, i32) {
    %c0_i32 = arith.constant 0 : i32
    %c0_i32_0 = arith.constant 0 : i32
    %c0_i32_1 = arith.constant 0 : i32
    return %c0_i32, %c0_i32_0 : i32, i32
  }
  func.func @transform_1(%arg0: i32) -> (i32, i32) {
    %c0_i32 = arith.constant 0 : i32
    %c0_i32_0 = arith.constant 0 : i32
    return %c0_i32, %arg0 : i32, i32
  }
  func.func @transform_2(%arg0: i32) -> (i32, i32) {
    %c0_i32 = arith.constant 0 : i32
    %c0_i32_0 = arith.constant 0 : i32
    return %c0_i32, %arg0 : i32, i32
  }
}

</mosaic_0001>

<bundles_post_ra>
// kernel: custom-call.3
= control target key start
LH: loop header
LB: loop body
LE: loop exit
PB: predicated region body
PF: predicated region fallthrough
CT: control target
= control target key end

     0   :  { %s6_s0 = inlined_call_operand.vmem [shape: f32[4,64], index: 0, kind: output, shape index: {}]  }

// kernel: moco_forward.3
= control target key start
LH: loop header
LB: loop body
LE: loop exit
PB: predicated region body
PF: predicated region fallthrough
CT: control target
= control target key end

     0   :  { %s591_s9 = smov 0   ;;  %s593_s10 = smov 0   ;;  %s698_s0 = inlined_call_operand.vmem [shape: bf16[4,128], index: 0, kind: input, shape index: {}]   ;;  %s699_s1 = inlined_call_operand.vmem [shape: bf16[128,512], index: 1, kind: input, shape index: {}]   ;;  %s700_s2 = inlined_call_operand.vmem [shape: f32[4,512], index: 2, kind: output, shape index: {}]  }
   0x1   :  { %s595_s11 = smov 0  }
   0x2 LB: > { %s434_s12 = sadd.s32 4294967295, %s574_s11   ;;  %s608_s13 = sadd.s32 1, %s574_s11   ;;  %s574_s11 = sphi %s595_s11, %s703_s11   ;;  %s570_s10 = sphi %s593_s10, %s702_s10   ;;  %s566_s9 = sphi %s591_s9, %s701_s9  }
   0x3   : > { %s37_s14 = ssub.s32 %s574_s11, %s608_s13  ;;  %s40_s15 = sadd.s32 1, %s570_s10 }
   0x4   : > { %p38_p0 = scmp.eq.s32.totalorder %s37_s14, 0  ;;  %p47_p1 = scmp.ne.s32.totalorder %s570_s10, %s566_s9 }
   0x5   : > { %p48_p2 = scmp.eq.s32.totalorder %s574_s11, 0  ;;  %p437_p4 = scmp.ge.s32.totalorder %s574_s11, 2 }
   0x6   : > { %s617_s16 = scalar_select %p38_p0, %s570_s10, %s40_s15  }
   0x7   : > { %p49_p3 = por %p48_p2, %p47_p1  ;;  %102 = sbr.rel (%p437_p4) target bundleno = 32 (0x20), region = 20 }
   0xc   : > { %105 = sbr.rel (!%p49_p3) target bundleno = 32 (0x20), region = 24  ;;  %s107_s17 = sand.u32 (%p49_p3), 1, %s570_s10  }
   0xd   : > { %s511_s18 = sshll.u32 (%p49_p3), %s574_s11, 3  ;;  %s438_s19 = sshll.u32 (%p49_p3), %s107_s17, 7 }
   0xe   : > { %s625_s22 = scalar_lea.vmem (%p49_p3), %s699_s1, %s511_s18  ;;  %s109_s23 = scalar_lea.vmem (%p49_p3), [#allocation2], %s438_s19 }
   0xf   : > { %v171_v0 = vld [vmem:[%s625_s22] sm:$0xff] (%p49_p3)  ;;  %v173_v1 = vld [vmem:[%s625_s22 + $0x10] sm:$0xff] (%p49_p3) }
  0x10   : > { %v175_v2 = vld [vmem:[%s625_s22 + $0x20] sm:$0xff] (%p49_p3)  ;;  %172 = vst [vmem:[%s109_s23] sm:$0xff] (%p49_p3), %v171_v0  ;;  %v177_v3 = vld [vmem:[%s625_s22 + $0x30] sm:$0xff] (%p49_p3) }
  0x11   : > { %174 = vst [vmem:[%s109_s23 + $0x8] sm:$0xff] %v173_v1  ;;  %v179_v4 = vld [vmem:[%s625_s22 + $0x40] sm:$0xff]  ;;  %v181_v5 = vld [vmem:[%s625_s22 + $0x50] sm:$0xff] }
  0x12   : > { %176 = vst [vmem:[%s109_s23 + $0x10] sm:$0xff] %v175_v2  ;;  %v183_v6 = vld [vmem:[%s625_s22 + $0x60] sm:$0xff]  ;;  %v185_v7 = vld [vmem:[%s625_s22 + $0x70] sm:$0xff] }
  0x13   : > { %178 = vst [vmem:[%s109_s23 + $0x18] sm:$0xff] %v177_v3  ;;  %v187_v8 = vld [vmem:[%s625_s22 + $0x80] sm:$0xff]  ;;  %v189_v9 = vld [vmem:[%s625_s22 + $0x90] sm:$0xff] }
  0x14   : > { %180 = vst [vmem:[%s109_s23 + $0x20] sm:$0xff] %v179_v4  ;;  %v191_v10 = vld [vmem:[%s625_s22 + $0xa0] sm:$0xff]  ;;  %v193_v11 = vld [vmem:[%s625_s22 + $0xb0] sm:$0xff] }
  0x15   : > { %182 = vst [vmem:[%s109_s23 + $0x28] sm:$0xff] %v181_v5  ;;  %v195_v12 = vld [vmem:[%s625_s22 + $0xc0] sm:$0xff]  ;;  %v197_v13 = vld [vmem:[%s625_s22 + $0xd0] sm:$0xff] }
  0x16   : > { %184 = vst [vmem:[%s109_s23 + $0x30] sm:$0xff] %v183_v6  ;;  %v199_v14 = vld [vmem:[%s625_s22 + $0xe0] sm:$0xff]  ;;  %v201_v15 = vld [vmem:[%s625_s22 + $0xf0] sm:$0xff] }
  0x17   : > { %186 = vst [vmem:[%s109_s23 + $0x38] sm:$0xff] %v185_v7 }
  0x18   : > { %188 = vst [vmem:[%s109_s23 + $0x40] sm:$0xff] %v187_v8 }
  0x19   : > { %190 = vst [vmem:[%s109_s23 + $0x48] sm:$0xff] %v189_v9 }
  0x1a   : > { %192 = vst [vmem:[%s109_s23 + $0x50] sm:$0xff] %v191_v10 }
  0x1b   : > { %194 = vst [vmem:[%s109_s23 + $0x58] sm:$0xff] %v193_v11 }
  0x1c   : > { %196 = vst [vmem:[%s109_s23 + $0x60] sm:$0xff] %v195_v12 }
  0x1d   : > { %198 = vst [vmem:[%s109_s23 + $0x68] sm:$0xff] %v197_v13 }
  0x1e   : > { %200 = vst [vmem:[%s109_s23 + $0x70] sm:$0xff] %v199_v14 }
  0x1f   : > { %202 = vst [vmem:[%s109_s23 + $0x78] sm:$0xff] %v201_v15 }
  0x20 PF: > { %p441_p5 = scmp.ge.s32.totalorder %s574_s11, 1  ;;  %p207_p6 = scmp.lt.s32.totalorder %s574_s11, 3 }
  0x22   : > { %p208_p7 = pnand %p441_p5, %p207_p6 }
  0x23   : > { %s214_s24 = sand.u32 (!%p208_p7), 1, %s566_s9   ;;  %s443_s29 = sshll.u32 (!%p208_p7), %s434_s12, 1 }
  0x24   : > { %211 = sbr.rel (%p208_p7) target bundleno = 210 (0xd2), region = 62  ;;  %s442_s25 = sshll.u32 (!%p208_p7), %s214_s24, 7 }
  0x25   : > { %s646_s26 = scalar_lea.vmem (!%p208_p7), [#allocation2], %s442_s25  ;;  %p237_p8 = scmp.lt.s32.totalorder (!%p208_p7), %s443_s29, 3 }
  0x29   : > { %v503_v16 = vld [vmem:[%s646_s26 + $0x70] sm:$0xf]  ;;  %v527_v17 = vld [vmem:[%s646_s26 + $0x74] sm:$0xf0]  ;;  %v526_v18 = vld [vmem:[%s646_s26 + $0x74] sm:$0xf] }
  0x2a   : > { %v504_v19 = vor.u32 %v527_v17, %v503_v16  ;;  %v505_v20 = vld [vmem:[%s646_s26 + $0x78] sm:$0xf0]  ;;  %v495_v21 = vld [vmem:[%s646_s26 + $0x60] sm:$0xf]  ;;  %v525_v22 = vld [vmem:[%s646_s26 + $0x64] sm:$0xf0] }
  0x2b   : > { %v508_v23 = vor.u32 %v526_v18, %v505_v20  ;;  %v524_v24 = vld [vmem:[%s646_s26 + $0x64] sm:$0xf]  ;;  %v497_v25 = vld [vmem:[%s646_s26 + $0x68] sm:$0xf0]  ;;  %v496_v26 = vor.u32 %v525_v22, %v495_v21  ;;  %v487_v28 = vld [vmem:[%s646_s26 + $0x50] sm:$0xf] }
  0x2c   : > { %339 = vmatpush.bf16.msra.mxu0 %v504_v19  ;;  %v500_v27 = vor.u32 %v524_v24, %v497_v25  ;;  %v523_v29 = vld [vmem:[%s646_s26 + $0x54] sm:$0xf0]  ;;  %v522_v30 = vld [vmem:[%s646_s26 + $0x54] sm:$0xf]  ;;  %v489_v31 = vld [vmem:[%s646_s26 + $0x58] sm:$0xf0] }
  0x2d   : > { %352 = vmatpush.bf16.msra.mxu1 %v508_v23  ;;  %v488_v32 = vor.u32 %v523_v29, %v487_v28  ;;  %v492_v33 = vor.u32 %v522_v30, %v489_v31  ;;  %v479_v34 = vld [vmem:[%s646_s26 + $0x40] sm:$0xf]  ;;  %v521_v35 = vld [vmem:[%s646_s26 + $0x44] sm:$0xf0]  ;;  %v520_v36 = vld [vmem:[%s646_s26 + $0x44] sm:$0xf] }
  0x2e   : > { %v481_v37 = vld [vmem:[%s646_s26 + $0x48] sm:$0xf0]  ;;  %v480_v38 = vor.u32 %v521_v35, %v479_v34  ;;  %v471_v40 = vld [vmem:[%s646_s26 + $0x30] sm:$0xf]  ;;  %v519_v41 = vld [vmem:[%s646_s26 + $0x34] sm:$0xf0] }
  0x2f   : > { %v484_v39 = vor.u32 %v520_v36, %v481_v37  ;;  %v518_v42 = vld [vmem:[%s646_s26 + $0x34] sm:$0xf]  ;;  %v473_v43 = vld [vmem:[%s646_s26 + $0x38] sm:$0xf0]  ;;  %v472_v44 = vor.u32 %v519_v41, %v471_v40  ;;  %v463_v46 = vld [vmem:[%s646_s26 + $0x20] sm:$0xf] }
  0x30   : > { %340 = vmatpush.bf16.msra.mxu0 %v496_v26  ;;  %v476_v45 = vor.u32 %v518_v42, %v473_v43  ;;  %v517_v47 = vld [vmem:[%s646_s26 + $0x24] sm:$0xf0]  ;;  %v516_v48 = vld [vmem:[%s646_s26 + $0x24] sm:$0xf]  ;;  %v465_v49 = vld [vmem:[%s646_s26 + $0x28] sm:$0xf0] }
  0x31   : > { %353 = vmatpush.bf16.msra.mxu1 %v500_v27  ;;  %v464_v50 = vor.u32 %v517_v47, %v463_v46  ;;  %v468_v51 = vor.u32 %v516_v48, %v465_v49  ;;  %v455_v52 = vld [vmem:[%s646_s26 + $0x10] sm:$0xf]  ;;  %v515_v53 = vld [vmem:[%s646_s26 + $0x14] sm:$0xf0]  ;;  %v514_v54 = vld [vmem:[%s646_s26 + $0x14] sm:$0xf] }
  0x32   : > { %v457_v55 = vld [vmem:[%s646_s26 + $0x18] sm:$0xf0]  ;;  %v456_v56 = vor.u32 %v515_v53, %v455_v52  ;;  %v447_v58 = vld [vmem:[%s646_s26] sm:$0xf]  ;;  %v513_v59 = vld [vmem:[%s646_s26 + $0x4] sm:$0xf0] }
  0x33   : > { %v460_v57 = vor.u32 %v514_v54, %v457_v55  ;;  %v512_v60 = vld [vmem:[%s646_s26 + $0x4] sm:$0xf]  ;;  %v449_v61 = vld [vmem:[%s646_s26 + $0x8] sm:$0xf0]  ;;  %v448_v62 = vor.u32 %v513_v59, %v447_v58  ;;  %v242_v0 = vld [vmem:[%s698_s0] sm:$0x3] }
  0x34   : > { %341 = vmatpush.bf16.msra.mxu0 %v488_v32  ;;  %v452_v63 = vor.u32 %v512_v60, %v449_v61  ;;  %s705_s29 = smov (!%p237_p8, %s443_s29), 3  ;;  %vm368_vm0 = vcmask 1043456  }
  0x35   : > { %354 = vmatpush.bf16.msra.mxu1 %v492_v33  ;;  %s444_s30 = sshll.u32 %s705_s29, 2 }
  0x36   : > { %s240_s5 = scalar_lea.vmem %s700_s2, %s444_s30 }
  0x38   : > { %342 = vmatpush.bf16.msra.mxu0 %v480_v38 }
  0x39   : > { %355 = vmatpush.bf16.msra.mxu1 %v484_v39 }
  0x3c   : > { %343 = vmatpush.bf16.msra.mxu0 %v472_v44 }
  0x3d   : > { %356 = vmatpush.bf16.msra.mxu1 %v476_v45 }
  0x40   : > { %344 = vmatpush.bf16.msra.mxu0 %v464_v50 }
  0x41   : > { %357 = vmatpush.bf16.msra.mxu1 %v468_v51 }
  0x44   : > { %345 = vmatpush.bf16.msra.mxu0 %v456_v56 }
  0x45   : > { %358 = vmatpush.bf16.msra.mxu1 %v460_v57 }
  0x48   : > { %346 = vmatpush.bf16.msra.mxu0 %v448_v62 }
  0x49   : > { %359 = vmatpush.bf16.msra.mxu1 %v452_v63 }
  0x4b   : > { %347 = vmatmul.bf16.vlgmr.msra.gmra.mxu0 %v242_v0 }
  0x4c   : > { %360 = vmatmul.bf16.vlgmr.msra.gmra.mxu1 %v242_v0 }
  0xc8   : > { %v348_v1 = vpop.f32.mrf.mxu0 }
  0xc9   : > { %v361_v2 = vpop.f32.mrf.mxu1 }
  0xca   : > { %v367_v3 = vrot.slane %v361_v2, 4 }
  0xcc   : > { %v369_v4 = vsel %vm368_vm0, %v348_v1, %v367_v3 }
  0xcd   : > { %371 = vst [vmem:[%s240_s5] sm:$0xff] %v369_v4 }
  0xd0   : > { %v350_v5 = vpop.f32.mrf.mxu0 }
  0xd1   : > { %v363_v6 = vpop.f32.mrf.mxu1 }
  0xd2 PF: > { %p9_p9 = scmp.ge.s32.totalorder %s608_s13, 4   ;;  %s701_s9 = smov %s570_s10 }
  0xd3   : > { %s702_s10 = smov %s617_s16  ;;  %s703_s11 = smov %s608_s13 }
  0xd4   :  { %11 = sbr.rel (!%p9_p9) target bundleno = 2 (0x2), region = 101 }

// kernel: moco_forward.2
= control target key start
LH: loop header
LB: loop body
LE: loop exit
PB: predicated region body
PF: predicated region fallthrough
CT: control target
= control target key end

     0   :  { %vm369_vm0 = vcmask 1043456   ;;  %s783_s2 = inlined_call_operand.vmem [shape: bf16[128,128], index: 2, kind: input, shape index: {}]   ;;  %s784_s6 = inlined_call_operand.vmem [shape: bf16[128,128], index: 6, kind: input, shape index: {}]   ;;  %s785_s4 = inlined_call_operand.vmem [shape: bf16[128,128], index: 4, kind: input, shape index: {}]   ;;  %s786_s8 = inlined_call_operand.vmem [shape: bf16[128,128], index: 8, kind: input, shape index: {}]   ;;  %s787_s3 = inlined_call_operand.vmem [shape: f32[1,128], index: 3, kind: input, shape index: {}]   ;;  %s788_s0 = inlined_call_operand.vmem [shape: bf16[4,128], index: 0, kind: input, shape index: {}]   ;;  %s789_s1 = inlined_call_operand.vmem [shape: bf16[4,128], index: 1, kind: input, shape index: {}]   ;;  %s790_s7 = inlined_call_operand.vmem [shape: f32[1,128], index: 7, kind: input, shape index: {}]   ;;  %s791_s5 = inlined_call_operand.vmem [shape: f32[1,128], index: 5, kind: input, shape index: {}]   ;;  %s792_s9 = inlined_call_operand.vmem [shape: f32[1,128], index: 9, kind: input, shape index: {}]   ;;  %s793_s10 = inlined_call_operand.vmem [shape: bf16[4,128], index: 10, kind: output, shape index: {0}]   ;;  %s794_s11 = inlined_call_operand.vmem [shape: bf16[4,128], index: 11, kind: output, shape index: {1}]   ;;  %s795_s12 = inlined_call_operand.vmem [shape: f32[4,128], index: 12, kind: output, shape index: {2}]  }
   0x1   :  { %v559_v0 = vld [vmem:[%s783_s2 + $0x38] sm:$0xff]  ;;  %v558_v2 = vld [vmem:[%s783_s2 + $0x30] sm:$0xff]  ;;  %v557_v4 = vld [vmem:[%s783_s2 + $0x28] sm:$0xff] }
   0x2   :  { %v575_v1 = vld [vmem:[%s784_s6 + $0x38] sm:$0xff]  ;;  %108 = vmatpush.bf16.msra.mxu0 %v559_v0  ;;  %v574_v3 = vld [vmem:[%s784_s6 + $0x30] sm:$0xff]  ;;  %v573_v5 = vld [vmem:[%s784_s6 + $0x28] sm:$0xff] }
   0x3   :  { %272 = vmatpush.bf16.msra.mxu2 %v575_v1  ;;  %v567_v6 = vld [vmem:[%s785_s4 + $0x38] sm:$0xff]  ;;  %v566_v8 = vld [vmem:[%s785_s4 + $0x30] sm:$0xff]  ;;  %v556_v10 = vld [vmem:[%s783_s2 + $0x20] sm:$0xff] }
   0x4   :  { %v583_v7 = vld [vmem:[%s786_s8 + $0x38] sm:$0xff]  ;;  %191 = vmatpush.bf16.msra.mxu1 %v567_v6  ;;  %v582_v9 = vld [vmem:[%s786_s8 + $0x30] sm:$0xff]  ;;  %v572_v11 = vld [vmem:[%s784_s6 + $0x20] sm:$0xff] }
   0x5   :  { %355 = vmatpush.bf16.msra.mxu3 %v583_v7  ;;  %v565_v12 = vld [vmem:[%s785_s4 + $0x28] sm:$0xff]  ;;  %v555_v14 = vld [vmem:[%s783_s2 + $0x18] sm:$0xff]  ;;  %v564_v16 = vld [vmem:[%s785_s4 + $0x20] sm:$0xff] }
   0x6   :  { %109 = vmatpush.bf16.msra.mxu0 %v558_v2  ;;  %v581_v13 = vld [vmem:[%s786_s8 + $0x28] sm:$0xff]  ;;  %v571_v15 = vld [vmem:[%s784_s6 + $0x18] sm:$0xff]  ;;  %v580_v17 = vld [vmem:[%s786_s8 + $0x20] sm:$0xff] }
   0x7   :  { %273 = vmatpush.bf16.msra.mxu2 %v574_v3  ;;  %v554_v18 = vld [vmem:[%s783_s2 + $0x10] sm:$0xff]  ;;  %v563_v20 = vld [vmem:[%s785_s4 + $0x18] sm:$0xff]  ;;  %v553_v22 = vld [vmem:[%s783_s2 + $0x8] sm:$0xff] }
   0x8   :  { %192 = vmatpush.bf16.msra.mxu1 %v566_v8  ;;  %v570_v19 = vld [vmem:[%s784_s6 + $0x10] sm:$0xff]  ;;  %v579_v21 = vld [vmem:[%s786_s8 + $0x18] sm:$0xff]  ;;  %v569_v23 = vld [vmem:[%s784_s6 + $0x8] sm:$0xff] }
   0x9   :  { %356 = vmatpush.bf16.msra.mxu3 %v582_v9  ;;  %v562_v24 = vld [vmem:[%s785_s4 + $0x10] sm:$0xff]  ;;  %v552_v25 = vld [vmem:[%s783_s2] sm:$0xff]  ;;  %v561_v29 = vld [vmem:[%s785_s4 + $0x8] sm:$0xff] }
   0xa   :  { %110 = vmatpush.bf16.msra.mxu0 %v557_v4  ;;  %v568_v26 = vld [vmem:[%s784_s6] sm:$0xff]  ;;  %v578_v30 = vld [vmem:[%s786_s8 + $0x10] sm:$0xff]  ;;  %v577_v32 = vld [vmem:[%s786_s8 + $0x8] sm:$0xff] }
   0xb   :  { %274 = vmatpush.bf16.msra.mxu2 %v573_v5  ;;  %v38_v27 = vld [vmem:[%s788_s0] sm:$0x3] }
   0xc   :  { %193 = vmatpush.bf16.msra.mxu1 %v565_v12  ;;  %v39_v28 = vld [vmem:[%s789_s1] sm:$0x3] }
   0xd   :  { %357 = vmatpush.bf16.msra.mxu3 %v581_v13  ;;  %v560_v31 = vld [vmem:[%s785_s4] sm:$0xff] }
   0xe   :  { %111 = vmatpush.bf16.msra.mxu0 %v556_v10  ;;  %v576_v33 = vld [vmem:[%s786_s8] sm:$0xff] }
   0xf   :  { %275 = vmatpush.bf16.msra.mxu2 %v572_v11  ;;  %v584_v34 = vld [vmem:[%s787_s3] ss:$0 sm:$0xff] }
  0x10   :  { %194 = vmatpush.bf16.msra.mxu1 %v564_v16  ;;  %v585_v38 = vld [vmem:[%s790_s7] ss:$0 sm:$0xff] }
  0x11   :  { %358 = vmatpush.bf16.msra.mxu3 %v580_v17  ;;  %v586_v46 = vld [vmem:[%s791_s5] ss:$0 sm:$0xff] }
  0x12   :  { %112 = vmatpush.bf16.msra.mxu0 %v555_v14  ;;  %v587_v52 = vld [vmem:[%s792_s9] ss:$0 sm:$0xff] }
  0x13   :  { %276 = vmatpush.bf16.msra.mxu2 %v571_v15 }
  0x14   :  { %195 = vmatpush.bf16.msra.mxu1 %v563_v20 }
  0x15   :  { %359 = vmatpush.bf16.msra.mxu3 %v579_v21 }
  0x16   :  { %113 = vmatpush.bf16.msra.mxu0 %v554_v18 }
  0x17   :  { %277 = vmatpush.bf16.msra.mxu2 %v570_v19 }
  0x18   :  { %196 = vmatpush.bf16.msra.mxu1 %v562_v24 }
  0x19   :  { %360 = vmatpush.bf16.msra.mxu3 %v578_v30 }
  0x1a   :  { %114 = vmatpush.bf16.msra.mxu0 %v553_v22 }
  0x1b   :  { %278 = vmatpush.bf16.msra.mxu2 %v569_v23 }
  0x1c   :  { %197 = vmatpush.bf16.msra.mxu1 %v561_v29 }
  0x1d   :  { %361 = vmatpush.bf16.msra.mxu3 %v577_v32 }
  0x1e   :  { %115 = vmatpush.bf16.msra.mxu0 %v552_v25 }
  0x1f   :  { %279 = vmatpush.bf16.msra.mxu2 %v568_v26 }
  0x20   :  { %198 = vmatpush.bf16.msra.mxu1 %v560_v31 }
  0x21   :  { %116 = vmatmul.bf16.vlgmr.msra.gmra.mxu0 %v38_v27  ;;  %362 = vmatpush.bf16.msra.mxu3 %v576_v33 }
  0x22   :  { %280 = vmatmul.bf16.vlgmr.msra.gmra.mxu2 %v39_v28 }
  0x9e   :  { %v117_v35 = vpop.f32.mrf.mxu0 }
  0x9f   :  { %v118_v36 = vadd.f32 %v584_v34, %v117_v35 }
  0xa1   :  { %v121_v37 = vmax.f32 %v118_v36, 0.0 }
  0xa3   :  { %v122_v39 = vpack.c.bf16 %v121_v37, %v121_v37 }
  0xa5   :  { %v281_v40 = vpop.f32.mrf.mxu2  ;;  %199 = vmatmul.bf16.vlgmr.msra.gmra.mxu1 %v122_v39 }
  0xa6   :  { %v282_v41 = vadd.f32 %v585_v38, %v281_v40  ;;  %v119_v42 = vpop.f32.mrf.mxu0 }
  0xa8   :  { %v285_v43 = vmax.f32 %v282_v41, 0.0 }
  0xaa   :  { %v286_v44 = vpack.c.bf16 %v285_v43, %v285_v43 }
  0xac   :  { %363 = vmatmul.bf16.vlgmr.msra.gmra.mxu3 %v286_v44 }
  0xad   :  { %v283_v45 = vpop.f32.mrf.mxu2 }
 0x122   :  { %v200_v47 = vpop.f32.mrf.mxu1 }
 0x123   :  { %v201_v48 = vadd.f32 %v586_v46, %v200_v47 }
 0x125   :  { %v368_v49 = vmul.f32 %v201_v48, %v201_v48 }
 0x127   :  { %v370_v50 = vsel %vm369_vm0, %v368_v49, 0.0 }
 0x128   :  { %371 = vadd.xlane.f32.xlu0 %v370_v50 }
 0x12a   :  { %v202_v51 = vpop.f32.mrf.mxu1 }
 0x12f   :  { %v364_v53 = vpop.f32.mrf.mxu3 }
 0x130   :  { %v365_v54 = vadd.f32 %v587_v52, %v364_v53 }
 0x132   :  { %v385_v55 = vmul.f32 %v365_v54, %v365_v54 }
 0x134   :  { %v386_v56 = vsel %vm369_vm0, %v385_v55, 0.0 }
 0x135   :  { %387 = vadd.xlane.f32.xlu0 %v386_v56 }
 0x137   :  { %v366_v57 = vpop.f32.mrf.mxu3 }
 0x19b   :  { %v372_v58 = vpop.xlane.xlu0 %371 }
 0x19c   :  { %v373_v59 = vmax.f32 %v372_v58, 1e-24 }
 0x19e   :  { %588 = vrsqrt.f32 %v373_v59  ;;  %vm380_vm2 = vweird.f32 %v373_v59 }
 0x1a4   :  { %v589_v60 = vpop.eup %588 }
 0x1a5   :  { %v375_v61 = vmul.f32 %v589_v60, %v373_v59  ;;  %vm381_vm1 = vweird.f32 %v589_v60 }
 0x1a6   :  { %vm382_vm3 = vmor %vm380_vm2, %vm381_vm1 }
 0x1a7   :  { %v376_v62 = vmul.f32 %v589_v60, %v375_v61 }
 0x1a8   :  { %v388_v63 = vpop.xlane.xlu0 %387 }
 0x1a9   :  { %v389_v0 = vmax.f32 %v388_v63, 1e-24  ;;  %v377_v1 = vmul.f32 0.5, %v376_v62 }
 0x1ab   :  { %590 = vrsqrt.f32 %v389_v0  ;;  %v378_v2 = vsub.f32 1.5, %v377_v1  ;;  %vm396_vm5 = vweird.f32 %v389_v0 }
 0x1ad   :  { %v379_v3 = vmul.f32 %v589_v60, %v378_v2 }
 0x1af   :  { %v383_v4 = vsel %vm382_vm3, %v589_v60, %v379_v3 }
 0x1b0   :  { %v384_v6 = vmul.f32 %v383_v4, %v201_v48 }
 0x1b1   :  { %v591_v5 = vpop.eup %590 }
 0x1b2   :  { %v391_v7 = vmul.f32 %v591_v5, %v389_v0  ;;  %v407_v8 = vmul.f32 14.285714, %v384_v6  ;;  %vm397_vm4 = vweird.f32 %v591_v5 }
 0x1b3   :  { %vm398_vm6 = vmor %vm396_vm5, %vm397_vm4 }
 0x1b4   :  { %v392_v9 = vmul.f32 %v591_v5, %v391_v7  ;;  %v408_v10 = vpack.c.bf16 %v407_v8, %v407_v8 }
 0x1b6   :  { %v393_v11 = vmul.f32 0.5, %v392_v9  ;;  %409 = vst [vmem:[%s793_s10] sm:$0x3] %v408_v10 }
 0x1b8   :  { %v394_v12 = vsub.f32 1.5, %v393_v11 }
 0x1ba   :  { %v395_v13 = vmul.f32 %v591_v5, %v394_v12 }
 0x1bc   :  { %v399_v14 = vsel %vm398_vm6, %v591_v5, %v395_v13 }
 0x1bd   :  { %v400_v15 = vmul.f32 %v399_v14, %v365_v54 }
 0x1bf   :  { %v401_v16 = vmul.f32 %v400_v15, %v384_v6  ;;  %v410_v17 = vpack.c.bf16 %v400_v15, %v400_v15 }
 0x1c1   :  { %v402_v18 = vsel %vm369_vm0, %v401_v16, 0.0  ;;  %411 = vst [vmem:[%s794_s11] sm:$0x3] %v410_v17 }
 0x1c2   :  { %403 = vadd.xlane.f32.xlu1 %v402_v18 }
 0x235   :  { %v404_v19 = vpop.xlane.xlu1 %403 }
 0x236   :  { %v405_v20 = vmul.f32 14.285714, %v404_v19 }
 0x238   :  { %406 = vst [vmem:[%s795_s12] sm:$0xf] %v405_v20 }

</bundles_post_ra>
